<compile_context>
chip_gen: v5e
topology: v5e:2x2
jax: 0.10.0
libtpu: 0.0.40
codegen_flags: <defaults>
</compile_context>

<pallas_src>
import jax
import jax.numpy as jnp
from jax.experimental import pallas as pl
from jax.experimental.pallas import tpu as pltpu


def _round_up(x, m):
    return ((x + m - 1) // m) * m


# ---------------------------------------------------------------------------
# Kernel 1: single-block fused Gemm + bias + ReLU (whole problem in VMEM)
# ---------------------------------------------------------------------------
def _gemm_bias_relu_single_kernel(x_ref, w_ref, b_ref, o_ref):
    y = jnp.dot(x_ref[...], w_ref[...], preferred_element_type=jnp.float32)
    y = y + b_ref[...]                       # (M, N) + (1, N) broadcast
    o_ref[...] = jnp.maximum(y, 0.0).astype(o_ref.dtype)


# ---------------------------------------------------------------------------
# Kernel 2a: tiled Gemm, f32 output -> accumulate directly into o_ref
# (output block is resident across the K axis: its index_map ignores k)
# ---------------------------------------------------------------------------
def _gemm_bias_relu_tiled_kernel_f32(x_ref, w_ref, b_ref, o_ref):
    k = pl.program_id(2)

    @pl.when(k == 0)
    def _():
        o_ref[...] = jnp.zeros_like(o_ref)

    o_ref[...] += jnp.dot(
        x_ref[...], w_ref[...], preferred_element_type=jnp.float32
    )

    @pl.when(k == pl.num_programs(2) - 1)
    def _():
        o_ref[...] = jnp.maximum(o_ref[...] + b_ref[...], 0.0)


# ---------------------------------------------------------------------------
# Kernel 2b: tiled Gemm, narrow output dtype -> f32 scratch accumulator
# ---------------------------------------------------------------------------
def _gemm_bias_relu_tiled_kernel_acc(x_ref, w_ref, b_ref, o_ref, acc_ref):
    k = pl.program_id(2)

    @pl.when(k == 0)
    def _():
        acc_ref[...] = jnp.zeros_like(acc_ref)

    acc_ref[...] += jnp.dot(
        x_ref[...], w_ref[...], preferred_element_type=jnp.float32
    )

    @pl.when(k == pl.num_programs(2) - 1)
    def _():
        o_ref[...] = jnp.maximum(acc_ref[...] + b_ref[...], 0.0).astype(o_ref.dtype)


# ---------------------------------------------------------------------------
# Dispatcher
# ---------------------------------------------------------------------------
_SINGLE_BLOCK_BYTES_LIMIT = 8 * 1024 * 1024   # conservative across v5e/v6e/v7x


def gemm_bias_relu(x, w, b, *, force_tiled=False):
    M, K = x.shape
    K2, N = w.shape
    assert K == K2 and b.shape == (N,)
    out_dtype = x.dtype
    b2d = b.reshape(1, N)

    itemsize = x.dtype.itemsize
    cost = pl.CostEstimate(
        flops=2 * M * N * K,
        bytes_accessed=(x.size + w.size + b.size + M * N) * itemsize,
        transcendentals=0,
    )

    total_bytes = (x.size + w.size + b.size + M * N) * itemsize
    if not force_tiled and total_bytes <= _SINGLE_BLOCK_BYTES_LIMIT:
        # Single-shot: whole operands as one VMEM block, no grid loop.
        return pl.pallas_call(
            _gemm_bias_relu_single_kernel,
            out_shape=jax.ShapeDtypeStruct((M, N), out_dtype),
            cost_estimate=cost,
        )(x, w, b2d)

    # ------------------ tiled path for large shapes ------------------
    tm = min(_round_up(M, 8), 256)
    tn = min(_round_up(N, 128), 256)     # >=2 N tiles for big N -> both v7x TCs busy
    tk = min(_round_up(K, 128), 512)
    Mp, Np, Kp = _round_up(M, tm), _round_up(N, tn), _round_up(K, tk)

    xp = x if (Mp == M and Kp == K) else jnp.pad(x, ((0, Mp - M), (0, Kp - K)))
    wp = w if (Kp == K and Np == N) else jnp.pad(w, ((0, Kp - K), (0, Np - N)))
    bp = b2d if Np == N else jnp.pad(b2d, ((0, 0), (0, Np - N)))

    if out_dtype == jnp.float32:
        kernel = _gemm_bias_relu_tiled_kernel_f32
        scratch = []
    else:
        kernel = _gemm_bias_relu_tiled_kernel_acc
        scratch = [pltpu.VMEM((tm, tn), jnp.float32)]

    yp = pl.pallas_call(
        kernel,
        out_shape=jax.ShapeDtypeStruct((Mp, Np), out_dtype),
        grid_spec=pltpu.PrefetchScalarGridSpec(
            num_scalar_prefetch=0,
            grid=(Mp // tm, Np // tn, Kp // tk),
            in_specs=[
                pl.BlockSpec((tm, tk), lambda i, j, k: (i, k)),   # X tile
                pl.BlockSpec((tk, tn), lambda i, j, k: (k, j)),   # W tile
                pl.BlockSpec((1, tn), lambda i, j, k: (0, j)),    # bias tile
            ],
            out_specs=pl.BlockSpec((tm, tn), lambda i, j, k: (i, j)),
            scratch_shapes=scratch,
        ),
        compiler_params=pltpu.CompilerParams(
            dimension_semantics=("parallel", "parallel", "arbitrary"),
        ),
        cost_estimate=cost,
    )(xp, wp, bp)

    if Mp != M or Np != N:
        yp = yp[:M, :N]
    return yp


# ---------------------------------------------------------------------------
# OnnxModule.forward equivalent (graph = single Gemm+ReLU node)
# ---------------------------------------------------------------------------
def onnx_module_forward(x, params, model_static_batch):
    """Reproduces OnnxModule.forward glue: static-batch reconciliation + graph run."""
    w, b = params

    slice_single_batch = model_static_batch != x.shape[0]
    # OnnxModule.forward np.tile's the input up to the model's static batch,
    # runs every replica, then keeps only [0:1].  GEMM rows are independent,
    # so running on the original batch and slicing gives identical output with
    # static_batch x less compute / HBM traffic.
    # TODO(synk): an arbitrary runtime-supplied ONNX graph cannot be translated
    # generically; this implements a representative Gemm+ReLU graph in Pallas.
    y = gemm_bias_relu(x, w, b)

    if slice_single_batch:
        y = y[0:1, ...]

    # flatten_structured_output / to_pt_tensors -> tuple of arrays
    return (y,)


# ---------------------------------------------------------------------------
# get_parameters equivalent: deterministic synthetic "initializers"
# ---------------------------------------------------------------------------
def make_parameters(key, in_features, out_features):
    kw, kb = jax.random.split(key)
    w = jax.random.normal(kw, (in_features, out_features), jnp.float32) * 0.02
    b = jax.random.normal(kb, (out_features,), jnp.float32) * 0.02
    return w, b


if __name__ == "__main__":
    key = jax.random.PRNGKey(0)
    k_x, k_p = jax.random.split(key)

    M, K, N = 8, 256, 128          # batch=8, in_features=256, out_features=128
    x = jax.random.normal(k_x, (M, K), jnp.float32)
    w, b = make_parameters(k_p, K, N)
    ref = jnp.maximum(x @ w + b, 0.0)

    # Path 1: static batch matches the input batch (single-block fast path).
    (y,) = onnx_module_forward(x, (w, b), model_static_batch=M)
    y = jax.block_until_ready(y)
    assert y.shape == (M, N)
    assert jnp.allclose(y, ref, atol=1e-4, rtol=1e-4)

    # Path 2: static batch differs -> output sliced to a single batch row.
    x1 = x[0:1]
    (y1,) = onnx_module_forward(x1, (w, b), model_static_batch=4)
    y1 = jax.block_until_ready(y1)
    assert y1.shape == (1, N)
    assert jnp.allclose(y1, ref[0:1], atol=1e-4, rtol=1e-4)

    # Path 3: exercise the tiled-grid path (used for shapes too big for VMEM).
    y2 = jax.block_until_ready(gemm_bias_relu(x, w, b, force_tiled=True))
    assert jnp.allclose(y2, ref, atol=1e-4, rtol=1e-4)

    print("KERNEL_OK")
</pallas_src>

<mosaic_0001>
module attributes {stable_mosaic.version = 11 : i64} {
  func.func @_gemm_bias_relu_single_kernel(%arg0: memref<8x256xf32, #tpu.memory_space<vmem>>, %arg1: memref<256x128xf32, #tpu.memory_space<vmem>>, %arg2: memref<1x128xf32, #tpu.memory_space<vmem>>, %arg3: memref<8x128xf32, #tpu.memory_space<vmem>>) attributes {dimension_semantics = [], scalar_prefetch = 0 : i64, scratch_operands = 0 : i64, tpu.core_type = #tpu.core_type<tc>} {
    %c0 = arith.constant 0 : index
    %c0_0 = arith.constant 0 : index
    %0 = vector.load %arg0[%c0, %c0_0] : memref<8x256xf32, #tpu.memory_space<vmem>>, vector<8x256xf32>
    %c0_1 = arith.constant 0 : index
    %c0_2 = arith.constant 0 : index
    %1 = vector.load %arg1[%c0_1, %c0_2] : memref<256x128xf32, #tpu.memory_space<vmem>>, vector<256x128xf32>
    %cst = arith.constant dense<0.000000e+00> : vector<8x128xf32>
    %2 = tpu.matmul %0, %1, %cst {dimension_numbers = #tpu.dot_dimension_numbers<[1], [0], [0], [1], [0, 0, 1, 1], [], []>} : vector<8x256xf32>, vector<256x128xf32>, vector<8x128xf32> -> vector<8x128xf32>
    %c0_3 = arith.constant 0 : index
    %c0_4 = arith.constant 0 : index
    %3 = vector.load %arg2[%c0_3, %c0_4] : memref<1x128xf32, #tpu.memory_space<vmem>>, vector<1x128xf32>
    %4 = vector.broadcast %3 : vector<1x128xf32> to vector<8x128xf32>
    %5 = arith.addf %2, %4 : vector<8x128xf32>
    %cst_5 = arith.constant 0.000000e+00 : f32
    %6 = vector.broadcast %cst_5 : f32 to vector<8x128xf32>
    %7 = arith.maximumf %5, %6 : vector<8x128xf32>
    %c0_6 = arith.constant 0 : index
    %c0_7 = arith.constant 0 : index
    %8 = vector.load %arg3[%c0_6, %c0_7] : memref<8x128xf32, #tpu.memory_space<vmem>>, vector<8x128xf32>
    tpu.vector_store %arg3[%c0_6, %c0_7], %7 {strides = array<i32>} : memref<8x128xf32, #tpu.memory_space<vmem>>, vector<8x128xf32>,
    return
  }
}

</mosaic_0001>

<bundles_post_ra>
// kernel: tpu_custom_call.1
= control target key start
LH: loop header
LB: loop body
LE: loop exit
PB: predicated region body
PF: predicated region fallthrough
CT: control target
= control target key end

     0   :  { %8 = vsyncpa [#allocation3], 0  ;;  %s264_s0 = inlined_call_operand.hbm [shape: f32[8,256], index: 0, kind: input, shape index: {}]   ;;  %s265_s1 = inlined_call_operand.hbm [shape: f32[256,128], index: 1, kind: input, shape index: {}]   ;;  %s266_s2 = inlined_call_operand.vmem [shape: f32[1,128], index: 2, kind: input, shape index: {}]   ;;  %s267_s3 = inlined_call_operand.hbm [shape: f32[8,128], index: 3, kind: output, shape index: {}]  }
   0x1   :  { %9 = vsyncpa [#allocation6], 0 }
   0x2   :  { %10 = vsyncpa [#allocation4], 0  ;;  %s16_s14 = sshll.u32 %s264_s0, 4  ;;  %s227_s15 = smov [#allocation2]   ;;  %s17_s14 = int_to_ptr.hbm [resolvable:$true] %s16_s14 }
   0x3   :  { %s18_s16 = sshll.u32 %s227_s15, 4  ;;  %s26_s19 = sshll.u32 %s265_s1, 4  ;;  %s19_s16 = int_to_ptr.vmem [resolvable:$true] %s18_s16  ;;  %s27_s19 = int_to_ptr.hbm [resolvable:$true] %s26_s19 }
   0x4   :  { %21 = dma.hbm_to_vmem [thread:$0]  %s17_s14, 256, %s19_s16, [#allocation3]  }
   0x5   :  { %s228_s20 = smov [#allocation5]   ;;  %s229_s22 = smov 128  }
   0x6   :  { %s28_s21 = sshll.u32 %s228_s20, 4  ;;  %s230_s23 = smov 8   ;;  %s29_s21 = int_to_ptr.vmem [resolvable:$true] %s28_s21 }
   0x7   :  { %34 = dma.hbm_to_vmem [thread:$0]  %s27_s19, 4096, %s29_s21, [#allocation6], %s229_s22, %s229_s22, %s230_s23  }
   0x8   :  { %221 = dma.done.wait [#allocation3], 256  }
   0x9   :  { %222 = vsyncadd [#allocation3], 4294967040 }
   0xa   :  { %223 = dma.done.wait [#allocation6], 4096  }
   0xb   :  { %224 = vsyncadd [#allocation6], 4294963200  ;;  %v62_v0 = vld [vmem:[#allocation5 + $0x78] sm:$0xff]  ;;  %v61_v1 = vld [vmem:[#allocation5 + $0x70] sm:$0xff]  ;;  %s231_s24 = smov [#allocation7]   ;;  %s132_s28 = sshll.u32 %s267_s3, 4  ;;  %s133_s28 = int_to_ptr.hbm [resolvable:$true] %s132_s28 }
   0xc   :  { %v78_v2 = vld [vmem:[#allocation5 + $0xf8] sm:$0xff]  ;;  %83 = vmatpush.msra.mxu0 %v62_v0  ;;  %v77_v3 = vld [vmem:[#allocation5 + $0xf0] sm:$0xff]  ;;  %v60_v4 = vld [vmem:[#allocation5 + $0x68] sm:$0xff]  ;;  %s130_s25 = sshll.u32 %s231_s24, 4  ;;  %s131_s25 = int_to_ptr.vmem [resolvable:$true] %s130_s25 }
   0xd   :  { %103 = vmatpush.msra.mxu1 %v78_v2  ;;  %v76_v5 = vld [vmem:[#allocation5 + $0xe8] sm:$0xff]  ;;  %v59_v6 = vld [vmem:[#allocation5 + $0x60] sm:$0xff]  ;;  %v58_v8 = vld [vmem:[#allocation5 + $0x58] sm:$0xff] }
   0xe   :  { %84 = vmatpush.msra.mxu0 %v61_v1  ;;  %v75_v7 = vld [vmem:[#allocation5 + $0xe0] sm:$0xff]  ;;  %v74_v9 = vld [vmem:[#allocation5 + $0xd8] sm:$0xff]  ;;  %v57_v10 = vld [vmem:[#allocation5 + $0x50] sm:$0xff] }
   0xf   :  { %104 = vmatpush.msra.mxu1 %v77_v3  ;;  %v73_v11 = vld [vmem:[#allocation5 + $0xd0] sm:$0xff]  ;;  %v56_v12 = vld [vmem:[#allocation5 + $0x48] sm:$0xff]  ;;  %v55_v14 = vld [vmem:[#allocation5 + $0x40] sm:$0xff] }
  0x10   :  { %85 = vmatpush.msra.mxu0 %v60_v4  ;;  %v72_v13 = vld [vmem:[#allocation5 + $0xc8] sm:$0xff]  ;;  %v71_v15 = vld [vmem:[#allocation5 + $0xc0] sm:$0xff]  ;;  %v54_v16 = vld [vmem:[#allocation5 + $0x38] sm:$0xff] }
  0x11   :  { %105 = vmatpush.msra.mxu1 %v76_v5  ;;  %v70_v17 = vld [vmem:[#allocation5 + $0xb8] sm:$0xff]  ;;  %v53_v18 = vld [vmem:[#allocation5 + $0x30] sm:$0xff]  ;;  %v52_v20 = vld [vmem:[#allocation5 + $0x28] sm:$0xff] }
  0x12   :  { %86 = vmatpush.msra.mxu0 %v59_v6  ;;  %v69_v19 = vld [vmem:[#allocation5 + $0xb0] sm:$0xff]  ;;  %v68_v21 = vld [vmem:[#allocation5 + $0xa8] sm:$0xff]  ;;  %v51_v22 = vld [vmem:[#allocation5 + $0x20] sm:$0xff] }
  0x13   :  { %106 = vmatpush.msra.mxu1 %v75_v7  ;;  %v67_v23 = vld [vmem:[#allocation5 + $0xa0] sm:$0xff]  ;;  %v50_v24 = vld [vmem:[#allocation5 + $0x18] sm:$0xff]  ;;  %v49_v26 = vld [vmem:[#allocation5 + $0x10] sm:$0xff] }
  0x14   :  { %87 = vmatpush.msra.mxu0 %v58_v8  ;;  %v66_v25 = vld [vmem:[#allocation5 + $0x98] sm:$0xff]  ;;  %v65_v27 = vld [vmem:[#allocation5 + $0x90] sm:$0xff]  ;;  %v48_v28 = vld [vmem:[#allocation5 + $0x8] sm:$0xff] }
  0x15   :  { %107 = vmatpush.msra.mxu1 %v74_v9  ;;  %v64_v29 = vld [vmem:[#allocation5 + $0x88] sm:$0xff]  ;;  %v47_v30 = vld [vmem:[#allocation5] sm:$0xff]  ;;  %v45_v32 = vld [vmem:[#allocation2] sm:$0xff] }
  0x16   :  { %88 = vmatpush.msra.mxu0 %v57_v10  ;;  %v63_v31 = vld [vmem:[#allocation5 + $0x80] sm:$0xff]  ;;  %v46_v33 = vld [vmem:[#allocation2 + $0x8] sm:$0xff]  ;;  %v148_v34 = vld [vmem:[%s266_s2] ss:$0 sm:$0xff] }
  0x17   :  { %108 = vmatpush.msra.mxu1 %v73_v11 }
  0x18   :  { %89 = vmatpush.msra.mxu0 %v56_v12 }
  0x19   :  { %109 = vmatpush.msra.mxu1 %v72_v13 }
  0x1a   :  { %90 = vmatpush.msra.mxu0 %v55_v14 }
  0x1b   :  { %110 = vmatpush.msra.mxu1 %v71_v15 }
  0x1c   :  { %91 = vmatpush.msra.mxu0 %v54_v16 }
  0x1d   :  { %111 = vmatpush.msra.mxu1 %v70_v17 }
  0x1e   :  { %92 = vmatpush.msra.mxu0 %v53_v18 }
  0x1f   :  { %112 = vmatpush.msra.mxu1 %v69_v19 }
  0x20   :  { %93 = vmatpush.msra.mxu0 %v52_v20 }
  0x21   :  { %113 = vmatpush.msra.mxu1 %v68_v21 }
  0x22   :  { %94 = vmatpush.msra.mxu0 %v51_v22 }
  0x23   :  { %114 = vmatpush.msra.mxu1 %v67_v23 }
  0x24   :  { %95 = vmatpush.msra.mxu0 %v50_v24 }
  0x25   :  { %115 = vmatpush.msra.mxu1 %v66_v25 }
  0x26   :  { %96 = vmatpush.msra.mxu0 %v49_v26 }
  0x27   :  { %116 = vmatpush.msra.mxu1 %v65_v27 }
  0x28   :  { %97 = vmatpush.msra.mxu0 %v48_v28 }
  0x29   :  { %117 = vmatpush.msra.mxu1 %v64_v29 }
  0x2a   :  { %98 = vmatpush.msra.mxu0 %v47_v30 }
  0x2b   :  { %118 = vmatpush.msra.mxu1 %v63_v31  ;;  %99 = vmatmul.f32.vlgmr.msra.gmra.mxu0 %v45_v32 }
  0x2c   :  { %119 = vmatmul.f32.vlgmr.msra.gmra.mxu1 %v46_v33 }
  0xa8   :  { %v100_v35 = vpop.f32.mrf.mxu0 }
  0xa9   :  { %v120_v36 = vpop.f32.mrf.mxu1  ;;  %v101_v37 = vadd.f32 %v148_v34, %v100_v35 }
  0xab   :  { %v121_v38 = vadd.f32 %v120_v36, %v101_v37 }
  0xad   :  { %v123_v39 = vmax.f32 %v121_v38, 0.0 }
  0xaf   :  { %124 = vst [vmem:[#allocation7] sm:$0xff] %v123_v39 }
  0xb0   :  { %135 = dma.vmem_to_hbm [thread:$0]  %s131_s25, 128, %s133_s28, [#allocation4]  }
  0xb1   :  { %225 = dma.done.wait [#allocation4], 128  }
  0xb2   :  { %226 = vsyncadd [#allocation4], 4294967168 }
  0xb3   :  { %140 = vsyncpa [#allocation3], 1 }
  0xb4   :  { %141 = vsyncpa [#allocation6], 1 }
  0xb5   :  { %142 = vsyncpa [#allocation4], 1 }

</bundles_post_ra>
